<compile_context>
chip_gen: v7x
topology: tpu7x:2x2x1
jax: 0.10.0
libtpu: 0.0.40
codegen_flags: <defaults>
</compile_context>

<pallas_src>
import jax
import jax.numpy as jnp
from jax.experimental import pallas as pl
from jax.experimental.pallas import tpu as pltpu


# ---------------------------------------------------------------------------
# Kernel
# ---------------------------------------------------------------------------
def _projector_kernel(x_ref, w_ref, o_ref):
    # x_ref: (Bt, C_in, TS)   w_ref: (C_out, C_in)   o_ref: (Bt, C_out, TS)
    w = w_ref[...]                                   # resident across grid steps
    bt = x_ref.shape[0]                              # static (block shape)
    for b in range(bt):                              # static unroll, Bt is small
        y = jnp.dot(w, x_ref[b], preferred_element_type=jnp.float32)  # MXU
        o_ref[b] = y.astype(o_ref.dtype)             # lane-dense store


# ---------------------------------------------------------------------------
# Tiling heuristics
# ---------------------------------------------------------------------------
def _round_up(x, m):
    return ((x + m - 1) // m) * m


def _cdiv(a, b):
    return -(-a // b)


def _choose_tiling(B, C_in, C_out, S, dtype_bytes, *, budget_bytes=32 << 20):
    """Pick (batch-block, spatial-tile, #spatial-steps, padded-S).

    The working-set budget accounts for sublane padding of the channel axes
    (f32 pads to 8 sublanes, bf16 to 16) and double buffering of the x / y
    tiles, plus the resident weight tile.
    """
    sub = 8 * max(1, 4 // dtype_bytes)        # sublane multiple for this dtype
    pc_in = _round_up(C_in, sub)
    pc_out = _round_up(C_out, sub)

    # Fold the whole batch into each block when it is small: amortizes the
    # ~0.35 us per-grid-step overhead (bt always divides B here).
    bt = B if B <= 8 else 1

    w_bytes = 2 * pc_out * pc_in * dtype_bytes            # weight (worst case 2 bufs)
    avail = max(budget_bytes - w_bytes, 0)
    per_lane = 2 * bt * (pc_in + pc_out) * dtype_bytes    # dbl-buffered x + y per lane
    ts = max((avail // per_lane) // 128 * 128, 128)

    s128 = _round_up(S, 128)
    ts = min(ts, s128)

    # Keep >= 2 total grid steps when possible so both v7x TensorCores stay busy.
    n_s = _cdiv(S, ts)
    if (B // bt) * n_s < 2 and s128 >= 256:
        ts = _round_up(_cdiv(s128, 2), 128)
        n_s = _cdiv(S, ts)

    s_pad = n_s * ts
    return bt, ts, n_s, s_pad


# ---------------------------------------------------------------------------
# Wrapper
# ---------------------------------------------------------------------------
def projector_block_3d(x, weight):
    """x: (B, C_in, D, H, W); weight: (C_out, C_in) or (C_out, C_in, 1, 1, 1)."""
    if weight.ndim == 5:
        weight = weight.reshape(weight.shape[0], weight.shape[1])
    B, C_in, D, H, W = x.shape
    C_out = weight.shape[0]
    S = D * H * W
    dtype_bytes = jnp.dtype(x.dtype).itemsize

    bt, ts, n_s, s_pad = _choose_tiling(B, C_in, C_out, S, dtype_bytes)

    x2 = x.reshape(B, C_in, S)                 # contiguous reshape: free
    if s_pad != S:
        # Pad spatial axis so every tile is lane-dense (unmasked vst stores).
        x2 = jnp.pad(x2, ((0, 0), (0, 0), (0, s_pad - S)))

    cost = pl.CostEstimate(
        flops=2 * B * S * C_in * C_out,
        transcendentals=0,
        bytes_accessed=(B * S * (C_in + C_out) + C_in * C_out) * dtype_bytes,
    )

    out = pl.pallas_call(
        _projector_kernel,
        out_shape=jax.ShapeDtypeStruct((B, C_out, s_pad), x.dtype),
        grid_spec=pltpu.PrefetchScalarGridSpec(
            num_scalar_prefetch=0,
            grid=(B // bt, n_s),
            in_specs=[
                pl.BlockSpec((bt, C_in, ts), lambda b, s: (b, 0, s)),
                pl.BlockSpec((C_out, C_in), lambda b, s: (0, 0)),   # resident
            ],
            out_specs=pl.BlockSpec((bt, C_out, ts), lambda b, s: (b, 0, s)),
        ),
        compiler_params=pltpu.CompilerParams(
            dimension_semantics=("parallel", "parallel"),
            vmem_limit_bytes=48 << 20,         # explicit: v5e default is 16 MiB,
        ),                                      # stays under v7x's 64 MiB VMEM
        cost_estimate=cost,
    )(x2, weight)

    if s_pad != S:
        out = out[:, :, :S]
    return out.reshape(B, C_out, D, H, W)


def _reference(x, weight):
    """Pure-JAX mirror of the PyTorch forward (1x1x1 conv, no bias)."""
    if weight.ndim == 5:
        weight = weight.reshape(weight.shape[0], weight.shape[1])
    return jnp.einsum("oc,bcdhw->bodhw", weight, x)


# ---------------------------------------------------------------------------
# Self-test
# ---------------------------------------------------------------------------
if __name__ == "__main__":
    def run_case(B, C_in, C_out, D, H, W, key):
        k_x, k_w = jax.random.split(key)
        x = jax.random.normal(k_x, (B, C_in, D, H, W), dtype=jnp.float32)
        # nn.Conv3d default init: U(-1/sqrt(fan_in), 1/sqrt(fan_in)), fan_in = C_in
        bound = 1.0 / (C_in ** 0.5)
        w = jax.random.uniform(k_w, (C_out, C_in, 1, 1, 1), jnp.float32,
                               -bound, bound)
        out = jax.block_until_ready(projector_block_3d(x, w))
        ref = _reference(x, w)
        assert out.shape == (B, C_out, D, H, W)
        assert jnp.allclose(out, ref, atol=1e-4, rtol=1e-4), "mismatch vs reference"

    key = jax.random.PRNGKey(0)
    k1, k2 = jax.random.split(key)

    run_case(2, 4, 8, 8, 16, 16, k1)   # S = 2048: lane-aligned main path, 2-step grid
    run_case(2, 4, 8, 3, 5, 7, k2)     # S = 105: exercises pad-to-128 path

    print("KERNEL_OK")
</pallas_src>

<mosaic_0001>
module attributes {stable_mosaic.version = 11 : i64} {
  func.func @_projector_kernel(%arg0: i32, %arg1: i32, %arg2: memref<2x4x1024xf32, #tpu.memory_space<vmem>>, %arg3: memref<8x4xf32, #tpu.memory_space<vmem>>, %arg4: memref<2x8x1024xf32, #tpu.memory_space<vmem>>) attributes {dimension_semantics = [#tpu.dimension_semantics<parallel>, #tpu.dimension_semantics<parallel>], iteration_bounds = array<i64: 1, 2>, scalar_prefetch = 0 : i64, scratch_operands = 0 : i64, tpu.core_type = #tpu.core_type<tc>, window_params = [{transform_indices = @transform_0, window_bounds = array<i64: 2, 4, 1024>}, {pipeline_mode = #tpu.pipeline_mode<synchronous>, transform_indices = @transform_1, window_bounds = array<i64: 8, 4>}, {transform_indices = @transform_2, window_bounds = array<i64: 2, 8, 1024>}]} {
    %c0 = arith.constant 0 : index
    %c0_0 = arith.constant 0 : index
    %0 = vector.load %arg3[%c0, %c0_0] : memref<8x4xf32, #tpu.memory_space<vmem>>, vector<8x4xf32>
    %c0_1 = arith.constant 0 : index
    %c0_2 = arith.constant 0 : index
    %c0_3 = arith.constant 0 : index
    %1 = vector.load %arg2[%c0_1, %c0_2, %c0_3] : memref<2x4x1024xf32, #tpu.memory_space<vmem>>, vector<1x4x1024xf32>
    %2 = vector.shape_cast %1 : vector<1x4x1024xf32> to vector<4x1024xf32>
    %cst = arith.constant dense<0.000000e+00> : vector<8x1024xf32>
    %3 = tpu.matmul %0, %2, %cst {dimension_numbers = #tpu.dot_dimension_numbers<[1], [0], [0], [1], [0, 0, 1, 1], [], []>} : vector<8x4xf32>, vector<4x1024xf32>, vector<8x1024xf32> -> vector<8x1024xf32>
    %c0_4 = arith.constant 0 : index
    %c0_5 = arith.constant 0 : index
    %c0_6 = arith.constant 0 : index
    %4 = vector.load %arg4[%c0_4, %c0_5, %c0_6] : memref<2x8x1024xf32, #tpu.memory_space<vmem>>, vector<1x8x1024xf32>
    %5 = vector.shape_cast %4 : vector<1x8x1024xf32> to vector<8x1024xf32>
    %6 = vector.shape_cast %3 : vector<8x1024xf32> to vector<1x8x1024xf32>
    tpu.vector_store %arg4[%c0_4, %c0_5, %c0_6], %6 {strides = array<i32>} : memref<2x8x1024xf32, #tpu.memory_space<vmem>>, vector<1x8x1024xf32>,
    %c1 = arith.constant 1 : index
    %c0_7 = arith.constant 0 : index
    %c0_8 = arith.constant 0 : index
    %7 = vector.load %arg2[%c1, %c0_7, %c0_8] : memref<2x4x1024xf32, #tpu.memory_space<vmem>>, vector<1x4x1024xf32>
    %8 = vector.shape_cast %7 : vector<1x4x1024xf32> to vector<4x1024xf32>
    %cst_9 = arith.constant dense<0.000000e+00> : vector<8x1024xf32>
    %9 = tpu.matmul %0, %8, %cst_9 {dimension_numbers = #tpu.dot_dimension_numbers<[1], [0], [0], [1], [0, 0, 1, 1], [], []>} : vector<8x4xf32>, vector<4x1024xf32>, vector<8x1024xf32> -> vector<8x1024xf32>
    %c1_10 = arith.constant 1 : index
    %c0_11 = arith.constant 0 : index
    %c0_12 = arith.constant 0 : index
    %10 = vector.load %arg4[%c1_10, %c0_11, %c0_12] : memref<2x8x1024xf32, #tpu.memory_space<vmem>>, vector<1x8x1024xf32>
    %11 = vector.shape_cast %10 : vector<1x8x1024xf32> to vector<8x1024xf32>
    %12 = vector.shape_cast %9 : vector<8x1024xf32> to vector<1x8x1024xf32>
    tpu.vector_store %arg4[%c1_10, %c0_11, %c0_12], %12 {strides = array<i32>} : memref<2x8x1024xf32, #tpu.memory_space<vmem>>, vector<1x8x1024xf32>,
    return
  }
  func.func @transform_0(%arg0: i32, %arg1: i32) -> (i32, i32, i32) {
    %c0_i32 = arith.constant 0 : i32
    %c0_i32_0 = arith.constant 0 : i32
    return %arg0, %c0_i32, %arg1 : i32, i32, i32
  }
  func.func @transform_1(%arg0: i32, %arg1: i32) -> (i32, i32) {
    %c0_i32 = arith.constant 0 : i32
    %c0_i32_0 = arith.constant 0 : i32
    %c0_i32_1 = arith.constant 0 : i32
    return %c0_i32, %c0_i32_0 : i32, i32
  }
  func.func @transform_2(%arg0: i32, %arg1: i32) -> (i32, i32, i32) {
    %c0_i32 = arith.constant 0 : i32
    %c0_i32_0 = arith.constant 0 : i32
    return %arg0, %c0_i32, %arg1 : i32, i32, i32
  }
}

</mosaic_0001>

<bundles_post_ra>
// kernel: tpu_custom_call.1
= control target key start
LH: loop header
LB: loop body
LE: loop exit
PB: predicated region body
PF: predicated region fallthrough
CT: control target
= control target key end

     0   :  { %7 = vsyncpa [#allocation3], 0  ;;  %s1435_s0 = inlined_call_operand.hbm [shape: f32[2,4,2048], index: 0, kind: input, shape index: {}]   ;;  %s1436_s1 = inlined_call_operand.vmem [shape: f32[8,4], index: 1, kind: input, shape index: {}]   ;;  %s1437_s2 = inlined_call_operand.hbm [shape: f32[2,8,2048], index: 2, kind: output, shape index: {}]  }
   0x1   :  { %9 = vsyncpa [#allocation3 + $0x1], 0 }
   0x2   :  { %10 = vsyncpa [#allocation4], 0 }
   0x3   :  { %12 = vsyncpa [#allocation4 + $0x1], 0  ;;  %s1205_s9 = smov 0   ;;  %s1207_s10 = smov 0  }
   0x4   :  { %s1209_s11 = smov 0   ;;  %s1211_s12 = smov 0  }
   0x5   :  { %s1213_s13 = smov 0   ;;  %s1215_s14 = smov 0  }
   0x6 LB: > { %s937_s15 = sadd.s32 4294967295, %s1179_s14   ;;  %s938_s16 = sadd.s32 4294967294, %s1179_s14   ;;  %s1179_s14 = sphi %s1215_s14, %s18_s14   ;;  %s1175_s13 = sphi %s1213_s13, %s1451_s13   ;;  %s1171_s12 = sphi %s1211_s12, %s1450_s12   ;;  %s1167_s11 = sphi %s1209_s11, %s1449_s11   ;;  %s1163_s10 = sphi %s1207_s10, %s1448_s10   ;;  %s1159_s9 = sphi %s1205_s9, %s1447_s9  }
   0x7   : > { %s27_s17 = sadd.s32 1, %s1175_s13  ;;  %s39_s18 = sadd.s32 1, %s1167_s11 }
   0x8   : > { %p28_p0 = scmp.ge.s32.totalorder %s27_s17, 2  ;;  %p46_p1 = scmp.ne.s32.totalorder %s1167_s11, %s1163_s10 }
   0x9   : > { %p47_p2 = scmp.eq.s32.totalorder %s1179_s14, 0  ;;  %p52_p3 = scmp.ne.s32.totalorder %s1163_s10, %s1159_s9 }
   0xa   : > { %s1453_s17 = smov (%p28_p0, %s27_s17), 0  ;;  %p53_p5 = scmp.eq.s32.totalorder %s937_s15, 0 }
   0xb   : > { %p1246_p4 = por %p47_p2, %p46_p1  ;;  %s35_s20 = ssub.s32 %s1175_s13, %s1453_s17 }
   0xc   : > { %p99_p6 = scmp.eq.s32.totalorder %s937_s15, 1  ;;  %p37_p7 = scmp.eq.s32.totalorder %s35_s20, 0 }
   0xd   : > { %p1252_p8 = por %p53_p5, %p52_p3  ;;  %p105_p10 = scmp.eq.s32.totalorder %s938_s16, 1 }
   0xe   : > { %p1256_p9 = por %p99_p6, %p46_p1  ;;  %p1002_p13 = scmp.lt.s32.totalorder %s1179_s14, 2 }
   0xf   : > { %s1261_s23 = scalar_select %p37_p7, %s1167_s11, %s39_s18  }
  0x10   : > { %s1441_s22 = scalar_select %p1256_p9, 1, 0 }
  0x11   : > { %p1263_p11 = por %p105_p10, %p52_p3  ;;  %s128_s25 = sand.u32 1, %s1167_s11  }
  0x12   : > { %s941_s26 = sshll.u32 %s128_s25, 6  ;;  %s988_s27 = sshll.u32 %s1175_s13, 9 }
  0x13   : > { %s1442_s24 = scalar_select %p1263_p11, 1, 0 }
  0x14   : > { %s1274_s30 = scalar_lea.hbm %s1435_s0, %s988_s27  ;;  %s132_s3 = scalar_lea.vmem [#allocation2], %s941_s26 }
  0x15   : > { %s142_s4 = sshll.u32 %s132_s3, 4  ;;  %p1280_p0 = pnand %p1002_p13, %p1246_p4  ;;  %s1276_s4 = int_to_ptr.vmem [resolvable:$true] %s142_s4 }
  0x16   : > { %s1284_s6 = scalar_lea.sflag [#allocation3], %s128_s25  ;;  %s1067_s7 = scalar_lea.hbm %s1274_s30, 1024 }
  0x17   : > { %p1068_p1 = scmp.ne.s32.totalorder %s1274_s30, %s1067_s7  ;;  %p1069_p2 = pneg %p1280_p0 }
  0x18   : > { %s1072_s16 = scalar_lea.hbm %s1435_s0, 2048  ;;  %p1073_p4 = scmp.lt.u32.totalorder %s1274_s30, %s1435_s0 }
  0x19   : > { %p1070_p3 = pnand %p1069_p2, %p1068_p1  ;;  %p1074_p6 = scmp.lt.u32.totalorder %s1072_s16, %s1067_s7 }
  0x1a   : > { %p1076_p10 = scmp.lt.u32.totalorder %s1067_s7, %s1274_s30 }
  0x1b   : > { %p1071_p5 = pneg %p1070_p3  ;;  %p1075_p7 = por %p1074_p6, %p1073_p4 }
  0x1d   : > { %p1077_p13 = por %p1076_p10, %p1075_p7 }
  0x1f   : > { %p1078_p12 = pnand %p1077_p13, %p1071_p5 }
  0x21   : > { %1081 = shalt.err (!%p1078_p12)
}
  0x22   : > { %s1082_s20 = scalar_lea.vmem %s1276_s4, 1024  ;;  %s1181_s25 = smov [#allocation2]  }
  0x23   : > { %p1083_p1 = scmp.ne.s32.totalorder %s1276_s4, %s1082_s20  ;;  %s1087_s26 = sshll.u32 %s1181_s25, 4  ;;  %s1088_s26 = int_to_ptr.vmem [resolvable:$false] %s1087_s26 }
  0x24   : > { %s1089_s27 = scalar_lea.vmem %s1088_s26, 2048  ;;  %p1090_p9 = scmp.lt.s32.totalorder %s1276_s4, %s1088_s26 }
  0x25   : > { %p1085_p3 = pnand %p1083_p1, %p1069_p2  ;;  %p1091_p4 = scmp.lt.s32.totalorder %s1089_s27, %s1082_s20 }
  0x27   : > { %p1086_p11 = pneg %p1085_p3  ;;  %p1092_p6 = por %p1091_p4, %p1090_p9 }
  0x29   : > { %p1093_p7 = pnand %p1092_p6, %p1086_p11 }
  0x2b   : > { %1096 = shalt.err (!%p1093_p7)
}
  0x2c   : > { %s1182_s28 = smov 1024   ;;  %s1183_s29 = smov 512  }
  0x2d   : > { %s1184_s3 = smov 32   ;;  %p944_p12 = scmp.ge.s32.totalorder %s1179_s14, 1 }
  0x2e   : > { %997 = dma.hbm_to_vmem [thread:$0]  (!%p1280_p0), %s1274_s30, 1024, %s1276_s4, %s1284_s6, %s1182_s28, %s1183_s29, %s1184_s3  }
  0x2f   : > { %p150_p2 = scmp.lt.s32.totalorder %s1179_s14, 3 }
  0x31   : > { %p151_p5 = pnand %p944_p12, %p150_p2 }
  0x32   : > { %s1315_s7 = sand.u32 (!%p151_p5), 1, %s1163_s10  }
  0x33   : > { %154 = sbr.rel (%p151_p5) target bundleno = 305 (0x131), region = 28  ;;  %s945_s8 = sshll.u32 (!%p151_p5), %s1315_s7, 6 }
  0x34   : > { %s157_s15 = scalar_lea.sflag (!%p151_p5), [#allocation3], %s1315_s7  ;;  %s1319_s16 = scalar_lea.vmem (!%p151_p5), [#allocation2], %s945_s8 }
  0x3a   : > { %1150 = dma.done.wait (%p1252_p8), %s157_s15, 1024  }
  0x3b   : > { %1152 = vsyncadd (%p1252_p8), %s157_s15, 4294966272  ;;  %v1185_v0 = vmov 0.0   ;;  %v186_v1 = vld [vmem:[%s1319_s16] sm:$0xff]  ;;  %vm202_vm0 = vcmask 1043456   ;;  %v187_v2 = vld [vmem:[%s1319_s16 + $0x8] sm:$0xff]  ;;  %vm198_vm1 = vcmask 31744  }
  0x3c   : > { %283 = vmatprep.mubr.f32.mxu0 %v1185_v0  ;;  %354 = vmatprep.mubr.f32.mxu1 %v1185_v0  ;;  %v194_v3 = vcombine.high %v186_v1, %v186_v1  ;;  %v195_v4 = vcombine.high %v187_v2, %v187_v2  ;;  %v188_v5 = vld [vmem:[%s1319_s16 + $0x10] sm:$0xff]  ;;  %v189_v6 = vld [vmem:[%s1319_s16 + $0x18] sm:$0xff]  ;;  %v185_v7 = vld [vmem:[%s1436_s1] sm:$0xff]  ;;  %s946_s21 = sshll.u32 %s1315_s7, 7  ;;  %s989_s6 = sshll.u32 %s1171_s12, 10 }
  0x3d   : > { %v196_v8 = vcombine.high %v188_v5, %v188_v5  ;;  %v197_v9 = vcombine.high %v189_v6, %v189_v6  ;;  %v959_v10 = vld [vmem:[%s1319_s16 + $0x20] sm:$0xff]  ;;  %v960_v11 = vld [vmem:[%s1319_s16 + $0x28] sm:$0xff]  ;;  %v961_v14 = vld [vmem:[%s1319_s16 + $0x30] sm:$0xff]  ;;  %s1361_s5 = scalar_lea.vmem [#allocation5], %s946_s21  ;;  %s1380_s25 = scalar_lea.hbm %s1437_s2, %s989_s6 }
  0x3e   : > { %947 = vmatprep.subr.msk.mxu0 %vm202_vm0, %v194_v3  ;;  %950 = vmatprep.subr.msk.mxu1 %vm202_vm0, %v195_v4  ;;  %v520_v12 = vcombine.high %v959_v10, %v959_v10  ;;  %v521_v13 = vcombine.high %v960_v11, %v960_v11  ;;  %v962_v15 = vld [vmem:[%s1319_s16 + $0x38] sm:$0xff]  ;;  %v522_v16 = vcombine.high %v961_v14, %v961_v14  ;;  %s850_s18 = sshll.u32 %s1361_s5, 4  ;;  %s834_s12 = scalar_lea.sflag [#allocation4], %s1315_s7  ;;  %s1382_s18 = int_to_ptr.vmem [resolvable:$true] %s850_s18 }
  0x3f   : > { %948 = vmatpush1.msk.msra.mxu0 %vm202_vm0, %v186_v1  ;;  %951 = vmatpush1.msk.msra.mxu1 %vm202_vm0, %v187_v2  ;;  %v523_v17 = vcombine.high %v962_v15, %v962_v15  ;;  %s1097_s26 = scalar_lea.vmem %s1382_s18, 2048  ;;  %p1444_p9 = scmp.ne.s32.totalorder %s1441_s22, 0 }
  0x40   : > { %949 = vmatmul.mubr.msk.f32.vlgmr.msra.gmra.mrb[0].mxu0 %vm198_vm1, %v185_v7  ;;  %952 = vmatmul.mubr.msk.f32.vlgmr.msra.gmra.mrb[0].mxu1 %vm198_vm1, %v185_v7  ;;  %p1098_p8 = scmp.ne.s32.totalorder %s1382_s18, %s1097_s26  ;;  %s1186_s27 = smov [#allocation5]  }
  0x41   : > { %953 = vmatprep.subr.msk.mxu0 %vm202_vm0, %v196_v8  ;;  %956 = vmatprep.subr.msk.mxu1 %vm202_vm0, %v197_v9  ;;  %s1101_s28 = sshll.u32 %s1186_s27, 4  ;;  %s1102_s28 = int_to_ptr.vmem [resolvable:$false] %s1101_s28 }
  0x42   : > { %954 = vmatpush1.msk.msra.mxu0 %vm202_vm0, %v188_v5  ;;  %957 = vmatpush1.msk.msra.mxu1 %vm202_vm0, %v189_v6  ;;  %p1099_p11 = pnand %p1098_p8, %p1444_p9  ;;  %s1103_s29 = scalar_lea.vmem %s1102_s28, 4096 }
  0x43   : > { %425 = vmatprep.mubr.f32.mxu0 %v1185_v0  ;;  %496 = vmatprep.mubr.f32.mxu1 %v1185_v0  ;;  %p1104_p10 = scmp.lt.s32.totalorder %s1382_s18, %s1102_s28  ;;  %p1105_p13 = scmp.lt.s32.totalorder %s1103_s29, %s1097_s26 }
  0x44   : > { %955 = vmatmul.mubr.msk.f32.vlgmr.msra.gmra.mrb[2].mxu0 %vm198_vm1, %v185_v7  ;;  %958 = vmatmul.mubr.msk.f32.vlgmr.msra.gmra.mrb[2].mxu1 %vm198_vm1, %v185_v7  ;;  %p1100_p0 = pneg %p1099_p11 }
  0x45   : > { %963 = vmatprep.subr.msk.mxu0 %vm202_vm0, %v520_v12  ;;  %966 = vmatprep.subr.msk.mxu1 %vm202_vm0, %v521_v13  ;;  %p1106_p1 = por %p1105_p13, %p1104_p10 }
  0x46   : > { %964 = vmatpush1.msk.msra.mxu0 %vm202_vm0, %v959_v10  ;;  %967 = vmatpush1.msk.msra.mxu1 %vm202_vm0, %v960_v11 }
  0x47   : > { %604 = vmatprep.mubr.f32.mxu0 %v1185_v0  ;;  %675 = vmatprep.mubr.f32.mxu1 %v1185_v0  ;;  %p1107_p3 = pnand %p1106_p1, %p1100_p0 }
  0x48   : > { %965 = vmatmul.mubr.msk.f32.vlgmr.msra.gmra.mrb[4].mxu0 %vm198_vm1, %v185_v7  ;;  %968 = vmatmul.mubr.msk.f32.vlgmr.msra.gmra.mrb[4].mxu1 %vm198_vm1, %v185_v7 }
  0x49   : > { %969 = vmatprep.subr.msk.mxu0 %vm202_vm0, %v522_v16  ;;  %972 = vmatprep.subr.msk.mxu1 %vm202_vm0, %v523_v17 }
  0x4a   : > { %970 = vmatpush1.msk.msra.mxu0 %vm202_vm0, %v961_v14  ;;  %973 = vmatpush1.msk.msra.mxu1 %vm202_vm0, %v962_v15 }
  0x4b   : > { %746 = vmatprep.mubr.f32.mxu0 %v1185_v0  ;;  %817 = vmatprep.mubr.f32.mxu1 %v1185_v0 }
  0x4c   : > { %971 = vmatmul.mubr.msk.f32.vlgmr.msra.gmra.mrb[6].mxu0 %vm198_vm1, %v185_v7  ;;  %974 = vmatmul.mubr.msk.f32.vlgmr.msra.gmra.mrb[6].mxu1 %vm198_vm1, %v185_v7 }
 0x113   : > { %v285_v18 = vpop.f32.mrb[0].mxu0  ;;  %v356_v19 = vpop.f32.mrb[0].mxu1 }
 0x114   : > { %503 = vst [vmem:[%s1361_s5] sm:$0xff] %v285_v18  ;;  %505 = vst [vmem:[%s1361_s5 + $0x10] sm:$0xff] %v356_v19  ;;  %v287_v20 = vpop.f32.mrb[1].mxu0  ;;  %v358_v21 = vpop.f32.mrb[1].mxu1 }
 0x115   : > { %504 = vst [vmem:[%s1361_s5 + $0x8] sm:$0xff] %v287_v20  ;;  %506 = vst [vmem:[%s1361_s5 + $0x18] sm:$0xff] %v358_v21 }
 0x117   : > { %v427_v22 = vpop.f32.mrb[2].mxu0  ;;  %v498_v23 = vpop.f32.mrb[2].mxu1 }
 0x118   : > { %507 = vst [vmem:[%s1361_s5 + $0x20] sm:$0xff] %v427_v22  ;;  %509 = vst [vmem:[%s1361_s5 + $0x30] sm:$0xff] %v498_v23  ;;  %v429_v24 = vpop.f32.mrb[3].mxu0  ;;  %v500_v25 = vpop.f32.mrb[3].mxu1 }
 0x119   : > { %508 = vst [vmem:[%s1361_s5 + $0x28] sm:$0xff] %v429_v24  ;;  %510 = vst [vmem:[%s1361_s5 + $0x38] sm:$0xff] %v500_v25 }
 0x11b   : > { %v606_v26 = vpop.f32.mrb[4].mxu0  ;;  %v677_v27 = vpop.f32.mrb[4].mxu1 }
 0x11c   : > { %975 = vst [vmem:[%s1361_s5 + $0x40] sm:$0xff] %v606_v26  ;;  %977 = vst [vmem:[%s1361_s5 + $0x50] sm:$0xff] %v677_v27  ;;  %v608_v28 = vpop.f32.mrb[5].mxu0  ;;  %v679_v29 = vpop.f32.mrb[5].mxu1 }
 0x11d   : > { %976 = vst [vmem:[%s1361_s5 + $0x48] sm:$0xff] %v608_v28  ;;  %978 = vst [vmem:[%s1361_s5 + $0x58] sm:$0xff] %v679_v29 }
 0x11f   : > { %v748_v30 = vpop.f32.mrb[6].mxu0  ;;  %v819_v31 = vpop.f32.mrb[6].mxu1 }
 0x120   : > { %979 = vst [vmem:[%s1361_s5 + $0x60] sm:$0xff] %v748_v30  ;;  %981 = vst [vmem:[%s1361_s5 + $0x70] sm:$0xff] %v819_v31  ;;  %v750_v32 = vpop.f32.mrb[7].mxu0  ;;  %v821_v33 = vpop.f32.mrb[7].mxu1 }
 0x121   : > { %980 = vst [vmem:[%s1361_s5 + $0x68] sm:$0xff] %v750_v32  ;;  %982 = vst [vmem:[%s1361_s5 + $0x78] sm:$0xff] %v821_v33 }
 0x122   : > { %1110 = shalt.err (!%p1107_p3)
}
 0x123   : > { %s1111_s3 = scalar_lea.hbm %s1380_s25, 2048  ;;  %s1115_s16 = scalar_lea.hbm %s1437_s2, 4096 }
 0x124   : > { %p1112_p4 = scmp.ne.s32.totalorder %s1380_s25, %s1111_s3  ;;  %p1116_p12 = scmp.lt.u32.totalorder %s1380_s25, %s1437_s2 }
 0x125   : > { %p1117_p2 = scmp.lt.u32.totalorder %s1115_s16, %s1111_s3  ;;  %p1119_p8 = scmp.lt.u32.totalorder %s1111_s3, %s1380_s25 }
 0x126   : > { %p1113_p6 = pnand %p1112_p4, %p1444_p9 }
 0x127   : > { %p1118_p5 = por %p1117_p2, %p1116_p12 }
 0x128   : > { %p1114_p7 = pneg %p1113_p6 }
 0x129   : > { %p1120_p11 = por %p1119_p8, %p1118_p5 }
 0x12b   : > { %p1121_p0 = pnand %p1120_p11, %p1114_p7 }
 0x12d   : > { %1124 = shalt.err (!%p1121_p0)
}
 0x12e   : > { %s1187_s21 = smov 1024   ;;  %s1188_s5 = smov 2048  }
 0x12f   : > { %s1189_s6 = smov 64  }
 0x130   : > { %992 = dma.vmem_to_hbm [thread:$0]  (%p1444_p9), %s1382_s18, 2048, %s1380_s25, %s834_s12, %s1187_s21, %s1188_s5, %s1189_s6  }
 0x131 PF: > { %s865_s19 = sand.u32 1, %s1159_s9   ;;  %p1445_p10 = scmp.ne.s32.totalorder %s1442_s24, 0 }
 0x132   : > { %p1446_p13 = scmp.ge.s32.totalorder %s1179_s14, 2  ;;  %s866_s20 = scalar_lea.sflag [#allocation4], %s865_s19 }
 0x134   : > { %p999_p1 = pnand %p1446_p13, %p1445_p10 }
 0x136   : > { %1154 = dma.done.wait (!%p999_p1), %s866_s20, 2048  }
 0x137   : > { %1156 = vsyncadd (!%p999_p1), %s866_s20, 4294965248  ;;  %s18_s14 = sadd.s32 1, %s1179_s14   ;;  %s1447_s9 = smov %s1163_s10 }
 0x138   : > { %p15_p3 = scmp.ge.s32.totalorder %s18_s14, 4   ;;  %s1448_s10 = smov %s1167_s11 }
 0x139   : > { %s1449_s11 = smov %s1261_s23  ;;  %s1450_s12 = smov %s1175_s13 }
 0x13a   : > { %s1451_s13 = smov %s1453_s17  ;;  %17 = sbr.rel (!%p15_p3) target bundleno = 6 (0x6), region = 75 }
 0x141   :  { %871 = vsyncpa [#allocation3], 1 }
 0x142   :  { %873 = vsyncpa [#allocation3 + $0x1], 1 }
 0x143   :  { %874 = vsyncpa [#allocation4], 1 }
 0x144   :  { %876 = vsyncpa [#allocation4 + $0x1], 1 }

</bundles_post_ra>
